<compile_context>
chip_gen: v7x
topology: tpu7x:2x2x1
jax: 0.10.0
libtpu: 0.0.40
codegen_flags: <defaults>
</compile_context>

<pallas_src>
import numpy as np
import jax
import jax.numpy as jnp
from jax.experimental import pallas as pl
from jax.experimental.pallas import tpu as pltpu

BN_EPS = 1e-5


# ----------------------------------------------------------------------------
# Static helpers
# ----------------------------------------------------------------------------
def bilinear_matrix(out_size: int, in_size: int) -> np.ndarray:
    """U[o, i]: F.interpolate(mode='bilinear', align_corners=True) per axis."""
    U = np.zeros((out_size, in_size), np.float32)
    if in_size == 1:
        U[:, 0] = 1.0
        return U
    for o in range(out_size):
        src = o * (in_size - 1) / (out_size - 1) if out_size > 1 else 0.0
        i0 = min(int(np.floor(src)), in_size - 2)
        frac = src - i0
        U[o, i0] = 1.0 - frac
        U[o, i0 + 1] = frac
    return U


def _pick_row_tile(h: int, target: int = 8) -> int:
    t = min(h, target)
    while h % t:
        t -= 1
    return t


def _pick_channel_tile(c: int, preferred) -> int:
    for t in preferred:
        if c % t == 0:
            return t
    return c


# ----------------------------------------------------------------------------
# Pallas kernel: fused Conv2d(3x3, stride 1, pad 1) + scale/shift + optional ReLU
# ----------------------------------------------------------------------------
def conv3x3_fused(xs, w_segs, scale, shift, *, relu,
                  compute_dtype=None, out_dtype=jnp.float32, tile_rows=None):
    """Conv3x3 over the (virtual) channel-concat of the S inputs in `xs`.

    xs     : list of S NHWC arrays (N, H, W, C) -- treated as if concatenated
             along channels; the concat is fused into the kernel.
    w_segs : (S, 3, 3, C, Cout) weights, Cin split into the S segments.
    scale  : (Cout,) per-channel multiplier (folded BN scale, or ones).
    shift  : (Cout,) per-channel additive term (folded BN shift, or conv bias).
    """
    S = len(xs)
    N, H, W, C = xs[0].shape
    Cout = w_segs.shape[-1]
    assert w_segs.shape == (S, 3, 3, C, Cout), (w_segs.shape, (S, 3, 3, C, Cout))
    for x in xs:
        assert x.shape == (N, H, W, C)

    cdt = compute_dtype if compute_dtype is not None else xs[0].dtype
    xs = [x.astype(cdt) for x in xs]
    w_segs = w_segs.astype(cdt)
    scale2 = scale.reshape(1, Cout).astype(jnp.float32)
    shift2 = shift.reshape(1, Cout).astype(jnp.float32)

    tH = tile_rows if tile_rows is not None else _pick_row_tile(H)
    assert H % tH == 0
    R = H // tH
    tCi = _pick_channel_tile(C, (128,))          # K per matmul = 3 * tCi
    tCo = _pick_channel_tile(Cout, (256, 128))   # lane-dense output tiles
    nCi, nCo = C // tCi, Cout // tCo

    def kernel(*refs):
        x_refs = refs[:3 * S]
        w_ref, sc_ref, sh_ref, o_ref, acc_ref = refs[3 * S:]
        r = pl.program_id(1)
        ci = pl.program_id(3)

        @pl.when(ci == 0)
        def _init():
            acc_ref[...] = jnp.zeros_like(acc_ref)

        acc = acc_ref[...]
        for s in range(S):
            main = x_refs[3 * s][0]                       # (tH, W, tCi)
            top = x_refs[3 * s + 1][0, 0]                 # (W, tCi): row above tile
            bot = x_refs[3 * s + 2][0, 0]                 # (W, tCi): row below tile
            top = jnp.where(r > 0, top, jnp.zeros_like(top))
            bot = jnp.where(r < R - 1, bot, jnp.zeros_like(bot))
            col = jnp.concatenate([top[None], main, bot[None]], axis=0)  # (tH+2, W, tCi)
            zc = jnp.zeros((tH + 2, 1, tCi), col.dtype)
            left = jnp.concatenate([zc, col[:, :W - 1, :]], axis=1)      # input col w-1
            right = jnp.concatenate([col[:, 1:, :], zc], axis=1)         # input col w+1
            # kw folded into K: channel order (kw=0 | kw=1 | kw=2), K = 3*tCi.
            win = jnp.concatenate([left, col, right], axis=-1)           # (tH+2, W, 3*tCi)
            for kh in range(3):
                mat = win[kh:kh + tH].reshape(tH * W, 3 * tCi)
                wk = w_ref[s, kh].reshape(3 * tCi, tCo)
                acc = acc + jnp.dot(mat, wk, preferred_element_type=jnp.float32)
        acc_ref[...] = acc

        @pl.when(ci == nCi - 1)
        def _finalize():
            y = acc * sc_ref[...] + sh_ref[...]
            if relu:
                y = jnp.maximum(y, 0.0)
            o_ref[0] = y.reshape(tH, W, tCo).astype(o_ref.dtype)

    in_specs = []
    operands = []
    for s in range(S):
        # main row tile + clamped 1-row halos (masked at the image border).
        in_specs.append(pl.BlockSpec(
            (1, tH, W, tCi), lambda n, r, co, ci: (n, r, 0, ci)))
        in_specs.append(pl.BlockSpec(
            (1, 1, W, tCi),
            lambda n, r, co, ci: (n, jnp.maximum(r * tH - 1, 0), 0, ci)))
        in_specs.append(pl.BlockSpec(
            (1, 1, W, tCi),
            lambda n, r, co, ci: (n, jnp.minimum(r * tH + tH, H - 1), 0, ci)))
        operands += [xs[s], xs[s], xs[s]]
    in_specs += [
        pl.BlockSpec((S, 3, 3, tCi, tCo), lambda n, r, co, ci: (0, 0, 0, ci, co)),
        pl.BlockSpec((1, tCo), lambda n, r, co, ci: (0, co)),
        pl.BlockSpec((1, tCo), lambda n, r, co, ci: (0, co)),
    ]
    operands += [w_segs, scale2, shift2]

    return pl.pallas_call(
        kernel,
        out_shape=jax.ShapeDtypeStruct((N, H, W, Cout), out_dtype),
        grid=(N, R, nCo, nCi),
        in_specs=in_specs,
        out_specs=pl.BlockSpec((1, tH, W, tCo), lambda n, r, co, ci: (n, r, 0, co)),
        scratch_shapes=[pltpu.VMEM((tH * W, tCo), jnp.float32)],
        compiler_params=pltpu.CompilerParams(
            dimension_semantics=("parallel", "parallel", "parallel", "arbitrary"),
            # fits v7x's 64 MiB physical VMEM; well under v5e/v6e's 128 MiB.
            vmem_limit_bytes=48 * 1024 * 1024),
    )(*operands)


# ----------------------------------------------------------------------------
# Glue ops (NHWC): 1x1 conv and bilinear align_corners=True upsampling
# ----------------------------------------------------------------------------
def conv1x1_nhwc(x, w, b):
    # w: (Cout, Cin), b: (Cout,)
    return jnp.einsum('nhwc,oc->nhwo', x, w) + b


def upsample_bilinear_nhwc(x, H, W):
    n, h, w, c = x.shape
    if (h, w) == (H, W):
        return x
    Uh = jnp.asarray(bilinear_matrix(H, h))
    Uw = jnp.asarray(bilinear_matrix(W, w))
    return jnp.einsum('Hh,nhwc,Ww->nHWc', Uh, x, Uw)


# ----------------------------------------------------------------------------
# Parameters (mirrors the PyTorch module, eval-mode BN stats)
# ----------------------------------------------------------------------------
def init_params(key, feature_channels, out_channels):
    n_levels = len(feature_channels)
    p = {"conv1x1": [], "conv3x3": []}
    for c_in in feature_channels[1:]:
        key, k1, k2 = jax.random.split(key, 3)
        p["conv1x1"].append(dict(
            w=jax.random.normal(k1, (out_channels, c_in), jnp.float32) / np.sqrt(c_in),
            b=0.1 * jax.random.normal(k2, (out_channels,), jnp.float32)))
    for _ in range(n_levels - 1):
        key, k1, k2 = jax.random.split(key, 3)
        p["conv3x3"].append(dict(
            w=0.05 * jax.random.normal(k1, (out_channels, out_channels, 3, 3), jnp.float32),
            b=0.1 * jax.random.normal(k2, (out_channels,), jnp.float32)))
    key, k1, k2, k3, k4, k5 = jax.random.split(key, 6)
    cat_ch = out_channels * n_levels
    p["fuse"] = dict(
        w=0.05 * jax.random.normal(k1, (out_channels, cat_ch, 3, 3), jnp.float32),
        gamma=1.0 + 0.1 * jax.random.normal(k2, (out_channels,), jnp.float32),
        beta=0.1 * jax.random.normal(k3, (out_channels,), jnp.float32),
        mean=0.1 * jax.random.normal(k4, (out_channels,), jnp.float32),
        var=jax.random.uniform(k5, (out_channels,), jnp.float32, 0.5, 1.5))
    return p


# ----------------------------------------------------------------------------
# FPNfuse forward (Pallas path)
# ----------------------------------------------------------------------------
def fpn_fuse_forward(features_nchw, params, *, compute_dtype=jnp.float32):
    """features_nchw: list of NCHW tensors, level 0 = highest resolution.
    NOTE: the PyTorch module requires feature_channels[0] == out_channels."""
    feats = [jnp.transpose(f, (0, 2, 3, 1)) for f in features_nchw]      # NHWC
    # 1x1 lateral projections for levels 1..L-1
    for i, pp in enumerate(params["conv1x1"], start=1):
        feats[i] = conv1x1_nhwc(feats[i], pp["w"], pp["b"])
    L = len(feats)

    # pairwise upscale(+align_corners bilinear) + add, deepest pair first
    pn = []
    for i in reversed(range(1, L)):
        tgt = feats[i - 1]
        up = upsample_bilinear_nhwc(feats[i], tgt.shape[1], tgt.shape[2])
        pn.append(up + tgt)

    # per-level 3x3 "smooth" convs (bias, no BN/ReLU) via the Pallas kernel
    smoothed = []
    for pp, x in zip(params["conv3x3"], pn):
        cout = pp["w"].shape[0]
        w_seg = jnp.transpose(pp["w"], (2, 3, 1, 0))[None]               # (1,3,3,Cin,Cout)
        smoothed.append(conv3x3_fused(
            [x], w_seg, jnp.ones((cout,), jnp.float32), pp["b"],
            relu=False, compute_dtype=compute_dtype))

    pn = list(reversed(smoothed))
    pn.append(feats[-1])
    H0, W0 = pn[0].shape[1], pn[0].shape[2]
    pn = [pn[0]] + [upsample_bilinear_nhwc(t, H0, W0) for t in pn[1:]]

    # conv_fuse: Conv3x3(no bias) + BN(eval) + ReLU, channel concat fused
    fp = params["fuse"]
    S = len(pn)
    Cout, cat_ch = fp["w"].shape[0], fp["w"].shape[1]
    C = cat_ch // S
    w_segs = jnp.transpose(fp["w"].reshape(Cout, S, C, 3, 3), (1, 3, 4, 2, 0))
    scale = fp["gamma"] / jnp.sqrt(fp["var"] + BN_EPS)
    shift = fp["beta"] - fp["mean"] * scale
    out_nhwc = conv3x3_fused(pn, w_segs, scale, shift, relu=True,
                             compute_dtype=compute_dtype)
    return jnp.transpose(out_nhwc, (0, 3, 1, 2))                          # NCHW


# ----------------------------------------------------------------------------
# Pure-XLA reference (mirrors the PyTorch forward, eval-mode BN)
# ----------------------------------------------------------------------------
def _conv2d_nchw_ref(x, w, b, padding, compute_dtype):
    y = jax.lax.conv_general_dilated(
        x.astype(compute_dtype), w.astype(compute_dtype), (1, 1), padding,
        dimension_numbers=("NCHW", "OIHW", "NCHW"),
        preferred_element_type=jnp.float32)
    if b is not None:
        y = y + b[None, :, None, None]
    return y


def _upsample_nchw_ref(x, H, W):
    if (x.shape[2], x.shape[3]) == (H, W):
        return x
    Uh = jnp.asarray(bilinear_matrix(H, x.shape[2]))
    Uw = jnp.asarray(bilinear_matrix(W, x.shape[3]))
    return jnp.einsum('Hh,nchw,Ww->ncHW', Uh, x, Uw)


def reference_forward(features_nchw, params, compute_dtype=jnp.float32):
    feats = list(features_nchw)
    for i, pp in enumerate(params["conv1x1"], start=1):
        feats[i] = _conv2d_nchw_ref(feats[i], pp["w"][:, :, None, None], pp["b"],
                                    "VALID", jnp.float32)
    L = len(feats)
    pn = []
    for i in reversed(range(1, L)):
        tgt = feats[i - 1]
        up = _upsample_nchw_ref(feats[i], tgt.shape[2], tgt.shape[3])
        pn.append(up + tgt)
    pn = [_conv2d_nchw_ref(x, pp["w"], pp["b"], "SAME", compute_dtype)
          for pp, x in zip(params["conv3x3"], pn)]
    pn = list(reversed(pn))
    pn.append(feats[-1])
    H0, W0 = pn[0].shape[2], pn[0].shape[3]
    pn = [pn[0]] + [_upsample_nchw_ref(t, H0, W0) for t in pn[1:]]
    cat = jnp.concatenate(pn, axis=1)
    fp = params["fuse"]
    scale = fp["gamma"] / jnp.sqrt(fp["var"] + BN_EPS)
    shift = fp["beta"] - fp["mean"] * scale
    y = _conv2d_nchw_ref(cat, fp["w"], None, "SAME", compute_dtype)
    y = y * scale[None, :, None, None] + shift[None, :, None, None]
    return jnp.maximum(y, 0.0)


# ----------------------------------------------------------------------------
if __name__ == "__main__":
    # Small but representative shapes.  feature_channels[0] must equal
    # out_channels (features[0] is added un-projected in the PyTorch module).
    feature_channels = (32, 48, 64, 96)
    out_channels = 32
    N = 2
    spatial = ((16, 16), (8, 8), (4, 4), (2, 2))

    key = jax.random.PRNGKey(0)
    feats = []
    for c, (h, w) in zip(feature_channels, spatial):
        key, kx = jax.random.split(key)
        feats.append(jax.random.normal(kx, (N, c, h, w), jnp.float32))
    key, kp = jax.random.split(key)
    params = init_params(kp, feature_channels, out_channels)

    # float32 end-to-end vs XLA reference.
    out = jax.block_until_ready(fpn_fuse_forward(feats, params))
    assert out.shape == (N, out_channels, 16, 16), out.shape
    ref = jax.block_until_ready(reference_forward(feats, params))
    np.testing.assert_allclose(np.asarray(out), np.asarray(ref), rtol=5e-3, atol=5e-3)

    # bf16 activations/weights with f32 accumulation (v6e/v7x production path),
    # checked against an XLA reference that applies the same bf16 casts.
    out_bf16 = jax.block_until_ready(
        fpn_fuse_forward(feats, params, compute_dtype=jnp.bfloat16))
    ref_bf16 = jax.block_until_ready(
        reference_forward(feats, params, compute_dtype=jnp.bfloat16))
    np.testing.assert_allclose(np.asarray(out_bf16), np.asarray(ref_bf16),
                               rtol=2e-2, atol=2e-2)

    print("KERNEL_OK")
</pallas_src>

<mosaic_0001>
module attributes {stable_mosaic.version = 11 : i64} {
  func.func @kernel(%arg0: i32, %arg1: i32, %arg2: i32, %arg3: i32, %arg4: memref<1x4x4x32xf32, #tpu.memory_space<vmem>>, %arg5: memref<1x1x4x32xf32, #tpu.memory_space<vmem>>, %arg6: memref<1x1x4x32xf32, #tpu.memory_space<vmem>>, %arg7: memref<1x3x3x32x32xf32, #tpu.memory_space<vmem>>, %arg8: memref<1x32xf32, #tpu.memory_space<vmem>>, %arg9: memref<1x32xf32, #tpu.memory_space<vmem>>, %arg10: memref<1x4x4x32xf32, #tpu.memory_space<vmem>>, %arg11: memref<16x32xf32, #tpu.memory_space<vmem>>) attributes {dimension_semantics = [#tpu.dimension_semantics<parallel>, #tpu.dimension_semantics<parallel>, #tpu.dimension_semantics<parallel>, #tpu.dimension_semantics<arbitrary>], iteration_bounds = array<i64: 2, 1, 1, 1>, scalar_prefetch = 0 : i64, scratch_operands = 1 : i64, tpu.core_type = #tpu.core_type<tc>, window_params = [{transform_indices = @transform_0, window_bounds = array<i64: 1, 4, 4, 32>}, {transform_indices = @transform_1, window_bounds = array<i64: 1, 1, 4, 32>}, {transform_indices = @transform_2, window_bounds = array<i64: 1, 1, 4, 32>}, {transform_indices = @transform_3, window_bounds = array<i64: 1, 3, 3, 32, 32>}, {transform_indices = @transform_4, window_bounds = array<i64: 1, 32>}, {transform_indices = @transform_5, window_bounds = array<i64: 1, 32>}, {transform_indices = @transform_6, window_bounds = array<i64: 1, 4, 4, 32>}]} {
    %c0_i32 = arith.constant 0 : i32
    %0 = arith.cmpi eq, %arg3, %c0_i32 : i32
    %1 = arith.extui %0 : i1 to i32
    %c0_i32_0 = arith.constant 0 : i32
    %2 = arith.cmpi ne, %1, %c0_i32_0 : i32
    scf.if %2 {
      %cst_38 = arith.constant 0.000000e+00 : f32
      %50 = vector.broadcast %cst_38 : f32 to vector<16x32xf32>
      %c0_39 = arith.constant 0 : index
      %c0_40 = arith.constant 0 : index
      %51 = vector.load %arg11[%c0_39, %c0_40] : memref<16x32xf32, #tpu.memory_space<vmem>>, vector<16x32xf32>
      tpu.vector_store %arg11[%c0_39, %c0_40], %50 {strides = array<i32>} : memref<16x32xf32, #tpu.memory_space<vmem>>, vector<16x32xf32>,
    } else {
    }
    %c0 = arith.constant 0 : index
    %c0_1 = arith.constant 0 : index
    %3 = vector.load %arg11[%c0, %c0_1] : memref<16x32xf32, #tpu.memory_space<vmem>>, vector<16x32xf32>
    %c0_2 = arith.constant 0 : index
    %c0_3 = arith.constant 0 : index
    %c0_4 = arith.constant 0 : index
    %c0_5 = arith.constant 0 : index
    %4 = vector.load %arg4[%c0_2, %c0_3, %c0_4, %c0_5] : memref<1x4x4x32xf32, #tpu.memory_space<vmem>>, vector<1x4x4x32xf32>
    %5 = vector.shape_cast %4 : vector<1x4x4x32xf32> to vector<4x4x32xf32>
    %c0_6 = arith.constant 0 : index
    %c0_7 = arith.constant 0 : index
    %c0_8 = arith.constant 0 : index
    %c0_9 = arith.constant 0 : index
    %6 = vector.load %arg5[%c0_6, %c0_7, %c0_8, %c0_9] : memref<1x1x4x32xf32, #tpu.memory_space<vmem>>, vector<1x1x4x32xf32>
    %7 = vector.shape_cast %6 : vector<1x1x4x32xf32> to vector<4x32xf32>
    %c0_10 = arith.constant 0 : index
    %c0_11 = arith.constant 0 : index
    %c0_12 = arith.constant 0 : index
    %c0_13 = arith.constant 0 : index
    %8 = vector.load %arg6[%c0_10, %c0_11, %c0_12, %c0_13] : memref<1x1x4x32xf32, #tpu.memory_space<vmem>>, vector<1x1x4x32xf32>
    %9 = vector.shape_cast %8 : vector<1x1x4x32xf32> to vector<4x32xf32>
    %c0_i32_14 = arith.constant 0 : i32
    %10 = arith.cmpi sgt, %arg1, %c0_i32_14 : i32
    %cst = arith.constant 0.000000e+00 : f32
    %11 = vector.broadcast %cst : f32 to vector<4x32xf32>
    %12 = arith.select %10, %7, %11 : vector<4x32xf32>
    %c0_i32_15 = arith.constant 0 : i32
    %13 = arith.cmpi slt, %arg1, %c0_i32_15 : i32
    %cst_16 = arith.constant 0.000000e+00 : f32
    %14 = vector.broadcast %cst_16 : f32 to vector<4x32xf32>
    %15 = arith.select %13, %9, %14 : vector<4x32xf32>
    %16 = vector.shape_cast %12 : vector<4x32xf32> to vector<1x4x32xf32>
    %17 = vector.shape_cast %15 : vector<4x32xf32> to vector<1x4x32xf32>
    %18 = tpu.concatenate %16, %5, %17 in 0 : vector<1x4x32xf32>, vector<4x4x32xf32>, vector<1x4x32xf32> -> vector<6x4x32xf32>
    %cst_17 = arith.constant 0.000000e+00 : f32
    %19 = vector.broadcast %cst_17 : f32 to vector<6x1x32xf32>
    %20 = vector.extract_strided_slice %18 {offsets = [0, 0, 0], sizes = [6, 3, 32], strides = [1, 1, 1]} : vector<6x4x32xf32> to vector<6x3x32xf32>
    %21 = tpu.concatenate %19, %20 in 1 : vector<6x1x32xf32>, vector<6x3x32xf32> -> vector<6x4x32xf32>
    %22 = vector.extract_strided_slice %18 {offsets = [0, 1, 0], sizes = [6, 3, 32], strides = [1, 1, 1]} : vector<6x4x32xf32> to vector<6x3x32xf32>
    %23 = tpu.concatenate %22, %19 in 1 : vector<6x3x32xf32>, vector<6x1x32xf32> -> vector<6x4x32xf32>
    %24 = tpu.concatenate %21, %18, %23 in 2 : vector<6x4x32xf32>, vector<6x4x32xf32>, vector<6x4x32xf32> -> vector<6x4x96xf32>
    %25 = vector.extract_strided_slice %24 {offsets = [0, 0, 0], sizes = [4, 4, 96], strides = [1, 1, 1]} : vector<6x4x96xf32> to vector<4x4x96xf32>
    %26 = vector.shape_cast %25 : vector<4x4x96xf32> to vector<16x96xf32>
    %c0_18 = arith.constant 0 : index
    %c0_19 = arith.constant 0 : index
    %c0_20 = arith.constant 0 : index
    %c0_21 = arith.constant 0 : index
    %c0_22 = arith.constant 0 : index
    %27 = vector.load %arg7[%c0_18, %c0_19, %c0_20, %c0_21, %c0_22] : memref<1x3x3x32x32xf32, #tpu.memory_space<vmem>>, vector<1x1x3x32x32xf32>
    %28 = vector.shape_cast %27 : vector<1x1x3x32x32xf32> to vector<3x32x32xf32>
    %29 = vector.shape_cast %28 : vector<3x32x32xf32> to vector<96x32xf32>
    %cst_23 = arith.constant dense<0.000000e+00> : vector<16x32xf32>
    %30 = tpu.matmul %26, %29, %cst_23 {dimension_numbers = #tpu.dot_dimension_numbers<[1], [0], [0], [1], [0, 0, 1, 1], [], []>} : vector<16x96xf32>, vector<96x32xf32>, vector<16x32xf32> -> vector<16x32xf32>
    %31 = arith.addf %3, %30 : vector<16x32xf32>
    %32 = vector.extract_strided_slice %24 {offsets = [1, 0, 0], sizes = [4, 4, 96], strides = [1, 1, 1]} : vector<6x4x96xf32> to vector<4x4x96xf32>
    %33 = vector.shape_cast %32 : vector<4x4x96xf32> to vector<16x96xf32>
    %c0_24 = arith.constant 0 : index
    %c1 = arith.constant 1 : index
    %c0_25 = arith.constant 0 : index
    %c0_26 = arith.constant 0 : index
    %c0_27 = arith.constant 0 : index
    %34 = vector.load %arg7[%c0_24, %c1, %c0_25, %c0_26, %c0_27] : memref<1x3x3x32x32xf32, #tpu.memory_space<vmem>>, vector<1x1x3x32x32xf32>
    %35 = vector.shape_cast %34 : vector<1x1x3x32x32xf32> to vector<3x32x32xf32>
    %36 = vector.shape_cast %35 : vector<3x32x32xf32> to vector<96x32xf32>
    %cst_28 = arith.constant dense<0.000000e+00> : vector<16x32xf32>
    %37 = tpu.matmul %33, %36, %cst_28 {dimension_numbers = #tpu.dot_dimension_numbers<[1], [0], [0], [1], [0, 0, 1, 1], [], []>} : vector<16x96xf32>, vector<96x32xf32>, vector<16x32xf32> -> vector<16x32xf32>
    %38 = arith.addf %31, %37 : vector<16x32xf32>
    %39 = vector.extract_strided_slice %24 {offsets = [2, 0, 0], sizes = [4, 4, 96], strides = [1, 1, 1]} : vector<6x4x96xf32> to vector<4x4x96xf32>
    %40 = vector.shape_cast %39 : vector<4x4x96xf32> to vector<16x96xf32>
    %c0_29 = arith.constant 0 : index
    %c2 = arith.constant 2 : index
    %c0_30 = arith.constant 0 : index
    %c0_31 = arith.constant 0 : index
    %c0_32 = arith.constant 0 : index
    %41 = vector.load %arg7[%c0_29, %c2, %c0_30, %c0_31, %c0_32] : memref<1x3x3x32x32xf32, #tpu.memory_space<vmem>>, vector<1x1x3x32x32xf32>
    %42 = vector.shape_cast %41 : vector<1x1x3x32x32xf32> to vector<3x32x32xf32>
    %43 = vector.shape_cast %42 : vector<3x32x32xf32> to vector<96x32xf32>
    %cst_33 = arith.constant dense<0.000000e+00> : vector<16x32xf32>
    %44 = tpu.matmul %40, %43, %cst_33 {dimension_numbers = #tpu.dot_dimension_numbers<[1], [0], [0], [1], [0, 0, 1, 1], [], []>} : vector<16x96xf32>, vector<96x32xf32>, vector<16x32xf32> -> vector<16x32xf32>
    %45 = arith.addf %38, %44 : vector<16x32xf32>
    %c0_34 = arith.constant 0 : index
    %c0_35 = arith.constant 0 : index
    %46 = vector.load %arg11[%c0_34, %c0_35] : memref<16x32xf32, #tpu.memory_space<vmem>>, vector<16x32xf32>
    tpu.vector_store %arg11[%c0_34, %c0_35], %45 {strides = array<i32>} : memref<16x32xf32, #tpu.memory_space<vmem>>, vector<16x32xf32>,
    %c0_i32_36 = arith.constant 0 : i32
    %47 = arith.cmpi eq, %arg3, %c0_i32_36 : i32
    %48 = arith.extui %47 : i1 to i32
    %c0_i32_37 = arith.constant 0 : i32
    %49 = arith.cmpi ne, %48, %c0_i32_37 : i32
    scf.if %49 {
      %c0_38 = arith.constant 0 : index
      %c0_39 = arith.constant 0 : index
      %50 = vector.load %arg8[%c0_38, %c0_39] : memref<1x32xf32, #tpu.memory_space<vmem>>, vector<1x32xf32>
      %51 = vector.broadcast %50 : vector<1x32xf32> to vector<16x32xf32>
      %52 = arith.mulf %45, %51 : vector<16x32xf32>
      %c0_40 = arith.constant 0 : index
      %c0_41 = arith.constant 0 : index
      %53 = vector.load %arg9[%c0_40, %c0_41] : memref<1x32xf32, #tpu.memory_space<vmem>>, vector<1x32xf32>
      %54 = vector.broadcast %53 : vector<1x32xf32> to vector<16x32xf32>
      %55 = arith.addf %52, %54 : vector<16x32xf32>
      %56 = vector.shape_cast %55 : vector<16x32xf32> to vector<4x4x32xf32>
      %c0_42 = arith.constant 0 : index
      %c0_43 = arith.constant 0 : index
      %c0_44 = arith.constant 0 : index
      %c0_45 = arith.constant 0 : index
      %57 = vector.load %arg10[%c0_42, %c0_43, %c0_44, %c0_45] : memref<1x4x4x32xf32, #tpu.memory_space<vmem>>, vector<1x4x4x32xf32>
      %58 = vector.shape_cast %57 : vector<1x4x4x32xf32> to vector<4x4x32xf32>
      %59 = vector.shape_cast %56 : vector<4x4x32xf32> to vector<1x4x4x32xf32>
      tpu.vector_store %arg10[%c0_42, %c0_43, %c0_44, %c0_45], %59 {strides = array<i32>} : memref<1x4x4x32xf32, #tpu.memory_space<vmem>>, vector<1x4x4x32xf32>,
    } else {
    }
    return
  }
  func.func @transform_0(%arg0: i32, %arg1: i32, %arg2: i32, %arg3: i32) -> (i32, i32, i32, i32) {
    %c0_i32 = arith.constant 0 : i32
    %c0_i32_0 = arith.constant 0 : i32
    return %arg0, %arg1, %c0_i32, %arg3 : i32, i32, i32, i32
  }
  func.func @transform_1(%arg0: i32, %arg1: i32, %arg2: i32, %arg3: i32) -> (i32, i32, i32, i32) {
    %c4_i32 = arith.constant 4 : i32
    %0 = arith.muli %arg1, %c4_i32 : i32
    %c1_i32 = arith.constant 1 : i32
    %1 = arith.subi %0, %c1_i32 : i32
    %c0_i32 = arith.constant 0 : i32
    %2 = arith.maxsi %1, %c0_i32 : i32
    %c0_i32_0 = arith.constant 0 : i32
    %c0_i32_1 = arith.constant 0 : i32
    return %arg0, %2, %c0_i32_0, %arg3 : i32, i32, i32, i32
  }
  func.func @transform_2(%arg0: i32, %arg1: i32, %arg2: i32, %arg3: i32) -> (i32, i32, i32, i32) {
    %c4_i32 = arith.constant 4 : i32
    %0 = arith.muli %arg1, %c4_i32 : i32
    %c4_i32_0 = arith.constant 4 : i32
    %1 = arith.addi %0, %c4_i32_0 : i32
    %c3_i32 = arith.constant 3 : i32
    %2 = arith.minsi %1, %c3_i32 : i32
    %c0_i32 = arith.constant 0 : i32
    %c0_i32_1 = arith.constant 0 : i32
    return %arg0, %2, %c0_i32, %arg3 : i32, i32, i32, i32
  }
  func.func @transform_3(%arg0: i32, %arg1: i32, %arg2: i32, %arg3: i32) -> (i32, i32, i32, i32, i32) {
    %c0_i32 = arith.constant 0 : i32
    %c0_i32_0 = arith.constant 0 : i32
    %c0_i32_1 = arith.constant 0 : i32
    %c0_i32_2 = arith.constant 0 : i32
    return %c0_i32, %c0_i32_0, %c0_i32_1, %arg3, %arg2 : i32, i32, i32, i32, i32
  }
  func.func @transform_4(%arg0: i32, %arg1: i32, %arg2: i32, %arg3: i32) -> (i32, i32) {
    %c0_i32 = arith.constant 0 : i32
    %c0_i32_0 = arith.constant 0 : i32
    return %c0_i32, %arg2 : i32, i32
  }
  func.func @transform_5(%arg0: i32, %arg1: i32, %arg2: i32, %arg3: i32) -> (i32, i32) {
    %c0_i32 = arith.constant 0 : i32
    %c0_i32_0 = arith.constant 0 : i32
    return %c0_i32, %arg2 : i32, i32
  }
  func.func @transform_6(%arg0: i32, %arg1: i32, %arg2: i32, %arg3: i32) -> (i32, i32, i32, i32) {
    %c0_i32 = arith.constant 0 : i32
    %c0_i32_0 = arith.constant 0 : i32
    return %arg0, %arg1, %c0_i32, %arg2 : i32, i32, i32, i32
  }
}

</mosaic_0001>

<bundles_post_ra>
// kernel: tpu_custom_call.1
= control target key start
LH: loop header
LB: loop body
LE: loop exit
PB: predicated region body
PF: predicated region fallthrough
CT: control target
= control target key end

     0   :  { %s2100_s0 = inlined_call_operand.hbm [shape: f32[2,4,4,32], index: 0, kind: input, shape index: {}]   ;;  %s2101_s1 = inlined_call_operand.hbm [shape: f32[2,4,4,32], index: 1, kind: input, shape index: {}]   ;;  %s2102_s2 = inlined_call_operand.hbm [shape: f32[2,4,4,32], index: 2, kind: input, shape index: {}]   ;;  %s2103_s3 = inlined_call_operand.hbm [shape: f32[1,3,3,32,32], index: 3, kind: input, shape index: {}]   ;;  %s2104_s4 = inlined_call_operand.vmem [shape: f32[1,32], index: 4, kind: input, shape index: {}]   ;;  %s2105_s5 = inlined_call_operand.vmem [shape: f32[1,32], index: 5, kind: input, shape index: {}]   ;;  %s2106_s6 = inlined_call_operand.hbm [shape: f32[2,4,4,32], index: 6, kind: output, shape index: {}]  }
   0x1   :  { %2127 = sst [smem:[#allocation24_spill]] %s2101_s1 }
   0x2   :  { %2128 = sst [smem:[#allocation25_spill]] %s2106_s6 }
   0x3   :  { %11 = vsyncpa [#allocation4], 0 }
   0x4   :  { %13 = vsyncpa [#allocation4 + $0x1], 0 }
   0x5   :  { %14 = vsyncpa [#allocation7], 0 }
   0x6   :  { %16 = vsyncpa [#allocation7 + $0x1], 0 }
   0x7   :  { %17 = vsyncpa [#allocation10], 0 }
   0x8   :  { %18 = vsyncpa [#allocation5], 0 }
   0x9   :  { %20 = vsyncpa [#allocation5 + $0x1], 0  ;;  %s1721_s21 = smov 0   ;;  %s1723_s22 = smov 0  }
   0xa   :  { %s1725_s23 = smov 0   ;;  %s1727_s24 = smov 0  }
   0xb   :  { %s1729_s25 = smov 0   ;;  %s1731_s26 = smov 0  }
   0xc LB: > { %2129 = sst [smem:[#allocation16_spill]] %s1651_s21  ;;  %s52_s27 = sadd.s32 1, %s1667_s25  ;;  %s1671_s26 = sphi %s1731_s26, %s26_s26   ;;  %s1667_s25 = sphi %s1729_s25, %s2165_s25   ;;  %s1663_s24 = sphi %s1727_s24, %s2164_s24   ;;  %s1659_s23 = sphi %s1725_s23, %s2163_s23   ;;  %s1655_s22 = sphi %s1723_s22, %s2167_s22   ;;  %s1651_s21 = sphi %s1721_s21, %s2166_s21  }
   0xd   : > { %2130 = sst [smem:[#allocation17_spill]] %s1659_s23  ;;  %s63_s28 = sadd.s32 1, %s1659_s23 }
   0xe   : > { %2131 = sst [smem:[#allocation18_spill]] %s1667_s25  ;;  %p54_p0 = scmp.ge.s32.totalorder %s52_s27, 2 }
   0xf   : > { %2132 = sst [smem:[#allocation19_spill]] %s1671_s26  ;;  %p2107_p1 = scmp.ne.s32.totalorder %s1659_s23, %s1655_s22 }
  0x10   : > { %p71_p2 = scmp.eq.s32.totalorder %s1671_s26, 0  ;;  %s2169_s27 = smov (%p54_p0, %s52_s27), 0 }
  0x11   : > { %2133 = sst [smem:[#allocation20_spill]] %s2169_s27  ;;  %p1403_p5 = scmp.lt.s32.totalorder %s1671_s26, 2 }
  0x12   : > { %p72_p4 = por %p71_p2, %p2107_p1  ;;  %s56_s29 = ssub.s32 %s1667_s25, %s2169_s27 }
  0x13   : > { %s1766_s30 = sand.u32 1, %s1659_s23   ;;  %p61_p6 = scmp.eq.s32.totalorder %s56_s29, 0 }
  0x14   : > { %s1769_s7 = sshll.u32 %s1667_s25, 8  ;;  %p1777_p7 = pnand %p1403_p5, %p72_p4 }
  0x15   : > { %s1775_s10 = scalar_lea.hbm %s2100_s0, %s1769_s7  ;;  %s339_s13 = sand.u32 1, %s1671_s26  }
  0x16   : > { %s2134_s11 = scalar_select %p1777_p7, 1, 0 }
  0x17   : > { %s1782_s12 = scalar_select %p61_p6, %s1659_s23, %s63_s28  }
  0x18   : > { %s2108_s14 = sshll.u32 %s1766_s30, 2  ;;  %s2136_s1 = sld [smem:[#allocation24_spill]] }
  0x19   : > { %2135 = sst [smem:[#allocation21_spill]] %s1782_s12  ;;  %s343_s18 = scalar_lea.vmem [#allocation6], %s2108_s14 }
  0x1a   : > { %s357_s19 = sshll.u32 %s343_s18, 4  ;;  %s1796_s20 = scalar_lea.sflag [#allocation7], %s339_s13  ;;  %s1794_s19 = int_to_ptr.vmem [resolvable:$true] %s357_s19 }
  0x1b   : > { %p1802_p9 = pneg %p1777_p7 }
  0x1d   : > { %s2137_s29 = scalar_select %p1802_p9, 1, 0 }
  0x1e   : > { %s1790_s17 = scalar_lea.hbm %s2136_s1, %s1769_s7  ;;  %s1468_s15 = scalar_lea.hbm %s2136_s1, 512 }
  0x1f   : > { %s1463_s28 = scalar_lea.hbm %s1790_s17, 64  ;;  %p1469_p12 = scmp.lt.u32.totalorder %s1790_s17, %s2136_s1 }
  0x20   : > { %p1464_p8 = scmp.ne.s32.totalorder %s1790_s17, %s1463_s28  ;;  %p1470_p13 = scmp.lt.u32.totalorder %s1468_s15, %s1463_s28 }
  0x21   : > { %p1472_p2 = scmp.lt.u32.totalorder %s1463_s28, %s1790_s17 }
  0x22   : > { %p1466_p10 = pnand %p1802_p9, %p1464_p8  ;;  %p1471_p0 = por %p1470_p13, %p1469_p12 }
  0x24   : > { %p1467_p11 = pneg %p1466_p10  ;;  %p1473_p4 = por %p1472_p2, %p1471_p0 }
  0x26   : > { %p1474_p5 = pnand %p1473_p4, %p1467_p11 }
  0x28   : > { %1477 = shalt.err (!%p1474_p5)
}
  0x29   : > { %s1478_s13 = scalar_lea.vmem %s1794_s19, 64  ;;  %s1673_s8 = smov [#allocation6]  }
  0x2a   : > { %p1479_p6 = scmp.ne.s32.totalorder %s1794_s19, %s1478_s13  ;;  %s1483_s9 = sshll.u32 %s1673_s8, 4  ;;  %s1484_s9 = int_to_ptr.vmem [resolvable:$false] %s1483_s9 }
  0x2b   : > { %s1485_s16 = scalar_lea.vmem %s1484_s9, 128  ;;  %p1486_p3 = scmp.lt.s32.totalorder %s1794_s19, %s1484_s9 }
  0x2c   : > { %p1481_p8 = pnand %p1479_p6, %p1802_p9  ;;  %p1487_p1 = scmp.lt.s32.totalorder %s1485_s16, %s1478_s13 }
  0x2e   : > { %p1482_p10 = pneg %p1481_p8  ;;  %p1488_p12 = por %p1487_p1, %p1486_p3 }
  0x30   : > { %p1489_p13 = pnand %p1488_p12, %p1482_p10 }
  0x32   : > { %1492 = shalt.err (!%p1489_p13)
}
  0x33   : > { %1394 = dma.hbm_to_vmem [thread:$0]  (!%p1777_p7), %s1790_s17, 64, %s1794_s19, %s1796_s20  }
  0x34   : > { %s1827_s28 = sadd.s32 4294967295, %s1671_s26   ;;  %s1131_s15 = sadd.s32 4294967294, %s1671_s26  }
  0x35   : > { %p76_p1 = scmp.ne.s32.totalorder %s1655_s22, %s1651_s21  ;;  %p2115_p3 = scmp.eq.s32.totalorder %s1827_s28, 0 }
  0x36   : > { %p260_p11 = scmp.eq.s32.totalorder %s1827_s28, 1  ;;  %p266_p0 = scmp.eq.s32.totalorder %s1131_s15, 1 }
  0x37   : > { %p1132_p2 = scmp.ge.s32.totalorder %s1671_s26, 1  ;;  %p1837_p4 = por %p2115_p3, %p76_p1 }
  0x38   : > { %p2139_p5 = scmp.ne.s32.totalorder %s1659_s23, %s1655_s22  ;;  %p1848_p8 = por %p266_p0, %p76_p1 }
  0x39   : > { %s2138_s18 = scalar_select %p1837_p4, 1, 0 }
  0x3a   : > { %p1844_p6 = por %p260_p11, %p2139_p5  ;;  %p273_p10 = scmp.lt.s32.totalorder %s1671_s26, 3 }
  0x3b   : > { %s2142_s19 = scalar_select %p1848_p8, 1, 0 }
  0x3c   : > { %s2140_s17 = scalar_select %p1844_p6, 1, 0 }
  0x3d   : > { %2143 = sst [smem:[#allocation23_spill]] %s2142_s19  ;;  %p1853_p12 = pnand %p1132_p2, %p273_p10 }
  0x3e   : > { %2141 = sst [smem:[#allocation22_spill]] %s2140_s17  ;;  %s1674_s8 = smov [#allocation9]  }
  0x3f   : > { %s2144_s13 = scalar_select %p1853_p12, 1, 0 }
  0x40   : > { %s289_s9 = sshll.u32 %s1674_s8, 4  ;;  %p1384_p13 = pneg %p1853_p12  ;;  %s1857_s9 = int_to_ptr.vmem [resolvable:$true] %s289_s9 }
  0x41   : > { %s1137_s16 = sshll.u32 %s1766_s30, 4  ;;  %s1493_s12 = scalar_lea.hbm %s2103_s3, 4608 }
  0x42   : > { %p1864_p11 = pnand %p1384_p13, %p2115_p3  ;;  %s319_s14 = scalar_lea.vmem [#allocation3], %s1137_s16 }
  0x43   : > { %s329_s1 = sshll.u32 %s319_s14, 4  ;;  %p1494_p1 = scmp.ne.s32.totalorder %s2103_s3, %s1493_s12  ;;  %s1868_s1 = int_to_ptr.vmem [resolvable:$true] %s329_s1 }
  0x44   : > { %p1495_p0 = pneg %p1864_p11  ;;  %p1500_p10 = scmp.lt.u32.totalorder %s1493_s12, %s2103_s3 }
  0x46   : > { %p1496_p2 = pnand %p1495_p0, %p1494_p1 }
  0x48   : > { %p1497_p5 = pneg %p1496_p2 }
  0x4a   : > { %p1502_p13 = pnand %p1500_p10, %p1497_p5 }
  0x4c   : > { %1505 = shalt.err (!%p1502_p13)
}
  0x4d   : > { %s1506_s14 = scalar_lea.vmem %s1857_s9, 4608  ;;  %p1514_p4 = scmp.lt.s32.totalorder %s1857_s9, %s1857_s9 }
  0x4e   : > { %p1507_p3 = scmp.ne.s32.totalorder %s1857_s9, %s1506_s14  ;;  %p1515_p12 = scmp.lt.s32.totalorder %s1506_s14, %s1506_s14 }
  0x50   : > { %p1509_p8 = pnand %p1507_p3, %p1495_p0  ;;  %p1516_p7 = por %p1515_p12, %p1514_p4 }
  0x52   : > { %p1510_p6 = pneg %p1509_p8 }
  0x54   : > { %p1517_p9 = pnand %p1516_p7, %p1510_p6 }
  0x56   : > { %1520 = shalt.err (!%p1517_p9)
}
  0x57   : > { %s1675_s23 = smov 128   ;;  %s1676_s25 = smov 8  }
  0x58   : > { %1387 = dma.hbm_to_vmem [thread:$0]  (!%p1864_p11), %s2103_s3, 4608, %s1857_s9, [#allocation10], %s1675_s23, %s1675_s23, %s1676_s25  }
  0x59   : > { %s1168_s12 = sadd.s32 192, %s1769_s7  ;;  %s316_s19 = scalar_lea.sflag [#allocation4], %s1766_s30 }
  0x5a   : > { %s1521_s16 = scalar_lea.hbm %s1775_s10, 256  ;;  %p2146_p9 = scmp.ne.s32.totalorder %s2137_s29, 0 }
  0x5b   : > { %p1522_p7 = scmp.ne.s32.totalorder %s1775_s10, %s1521_s16  ;;  %s1526_s21 = scalar_lea.hbm %s2100_s0, 512 }
  0x5c   : > { %p1527_p6 = scmp.lt.u32.totalorder %s1775_s10, %s2100_s0  ;;  %p1528_p8 = scmp.lt.u32.totalorder %s1526_s21, %s1521_s16 }
  0x5d   : > { %p1524_p3 = pnand %p1522_p7, %p2146_p9  ;;  %p1530_p1 = scmp.lt.u32.totalorder %s1521_s16, %s1775_s10 }
  0x5e   : > { %p1529_p12 = por %p1528_p8, %p1527_p6 }
  0x5f   : > { %p1525_p4 = pneg %p1524_p3 }
  0x60   : > { %p1531_p0 = por %p1530_p1, %p1529_p12 }
  0x62   : > { %p1532_p11 = pnand %p1531_p0, %p1525_p4 }
  0x64   : > { %1535 = shalt.err (!%p1532_p11)
}
  0x65   : > { %s1536_s9 = scalar_lea.vmem %s1868_s1, 256  ;;  %s1677_s15 = smov [#allocation3]  }
  0x66   : > { %p1537_p2 = scmp.ne.s32.totalorder %s1868_s1, %s1536_s9  ;;  %s1541_s23 = sshll.u32 %s1677_s15, 4  ;;  %s1542_s23 = int_to_ptr.vmem [resolvable:$false] %s1541_s23 }
  0x67   : > { %s1543_s6 = scalar_lea.vmem %s1542_s23, 512  ;;  %p1544_p13 = scmp.lt.s32.totalorder %s1868_s1, %s1542_s23 }
  0x68   : > { %p1539_p5 = pnand %p1537_p2, %p2146_p9  ;;  %p1545_p7 = scmp.lt.s32.totalorder %s1543_s6, %s1536_s9 }
  0x6a   : > { %p1540_p10 = pneg %p1539_p5  ;;  %p1546_p3 = por %p1545_p7, %p1544_p13 }
  0x6c   : > { %p1547_p6 = pnand %p1546_p3, %p1540_p10 }
  0x6e   : > { %1550 = shalt.err (!%p1547_p6)
}
  0x6f   : > { %s1678_s21 = smov 64   ;;  %s1679_s17 = smov 4  }
  0x70   : > { %p2147_p4 = scmp.ne.s32.totalorder %s2134_s11, 0  ;;  %s1921_s27 = scalar_lea.hbm %s2102_s2, %s1168_s12 }
  0x71   : > { %s2148_s16 = sshll.u32 %s1766_s30, 2  ;;  %s1551_s9 = scalar_lea.hbm %s1921_s27, 64 }
  0x72   : > { %1391 = dma.hbm_to_vmem [thread:$0]  (!%p2147_p4), %s1775_s10, 256, %s1868_s1, %s316_s19, %s1678_s21, %s1678_s21, %s1679_s17  }
  0x73   : > { %s368_s8 = scalar_lea.vmem [#allocation8], %s2148_s16  ;;  %p1552_p8 = scmp.ne.s32.totalorder %s1921_s27, %s1551_s9 }
  0x74   : > { %s382_s14 = sshll.u32 %s368_s8, 4  ;;  %s1556_s10 = scalar_lea.hbm %s2102_s2, 512  ;;  %s383_s14 = int_to_ptr.vmem [resolvable:$true] %s382_s14 }
  0x75   : > { %p1554_p12 = pnand %p1552_p8, %p2146_p9  ;;  %p1557_p0 = scmp.lt.u32.totalorder %s1921_s27, %s2102_s2 }
  0x76   : > { %p1558_p11 = scmp.lt.u32.totalorder %s1556_s10, %s1551_s9  ;;  %p1560_p5 = scmp.lt.u32.totalorder %s1551_s9, %s1921_s27 }
  0x77   : > { %p1555_p1 = pneg %p1554_p12 }
  0x78   : > { %p1559_p2 = por %p1558_p11, %p1557_p0 }
  0x7a   : > { %p1561_p10 = por %p1560_p5, %p1559_p2 }
  0x7c   : > { %p1562_p13 = pnand %p1561_p10, %p1555_p1 }
  0x7e   : > { %1565 = shalt.err (!%p1562_p13)
}
  0x7f   : > { %s1566_s30 = scalar_lea.vmem %s383_s14, 64  ;;  %s1680_s15 = smov [#allocation8]  }
  0x80   : > { %p1567_p7 = scmp.ne.s32.totalorder %s383_s14, %s1566_s30  ;;  %s1571_s23 = sshll.u32 %s1680_s15, 4  ;;  %s1572_s23 = int_to_ptr.vmem [resolvable:$false] %s1571_s23 }
  0x81   : > { %s1573_s6 = scalar_lea.vmem %s1572_s23, 128  ;;  %p1574_p8 = scmp.lt.s32.totalorder %s383_s14, %s1572_s23 }
  0x82   : > { %p1569_p3 = pnand %p1567_p7, %p2146_p9  ;;  %p1575_p12 = scmp.lt.s32.totalorder %s1573_s6, %s1566_s30 }
  0x84   : > { %p1570_p6 = pneg %p1569_p3  ;;  %p1576_p4 = por %p1575_p12, %p1574_p8 }
  0x86   : > { %p1577_p0 = pnand %p1576_p4, %p1570_p6 }
  0x88   : > { %1580 = shalt.err (!%p1577_p0)
}
  0x89   : > { %p2149_p11 = scmp.ne.s32.totalorder %s2134_s11, 0  ;;  %p2150_p1 = scmp.ne.s32.totalorder %s2144_s13, 0 }
  0x8a   : > { %s1946_s29 = sand.u32 (!%p2150_p1), 1, %s1655_s22   ;;  %p2151_p9 = scmp.ne.s32.totalorder (!%p2150_p1), %s2138_s18, 0 }
  0x8b   : > { %1397 = dma.hbm_to_vmem [thread:$0]  (!%p2149_p11), %s1921_s27, 64, %s383_s14, %s1796_s20  }
  0x8c   : > { %391 = sbr.rel (%p2150_p1) target bundleno = 546 (0x222), region = 44  ;;  %s1147_s21 = sshll.u32 (!%p2150_p1), %s1946_s29, 4 }
  0x8d   : > { %s394_s17 = scalar_lea.sflag (!%p2150_p1), [#allocation4], %s1946_s29  ;;  %s397_s25 = scalar_lea.vmem (!%p2150_p1), [#allocation3], %s1147_s21 }
  0x93   : > { %1634 = dma.done.wait (%p2151_p9), %s394_s17, 256  }
  0x94   : > { %1636 = vsyncadd (%p2151_p9), %s394_s17, 4294967040  ;;  %s402_s11 = sand.u32 1, %s1827_s28  }
  0x95   : > { %s403_s20 = scalar_lea.sflag [#allocation7], %s402_s11 }
  0x96   : > { %1638 = dma.done.wait (%p2151_p9), %s403_s20, 128  }
  0x97   : > { %1640 = vsyncadd (%p2151_p9), %s403_s20, 4294967168  ;;  %p2152_p4 = scmp.eq.s32.totalorder %s1827_s28, 0 }
  0x99   : > { %1642 = dma.done.wait (%p2152_p4), [#allocation10], 4608   ;;  %p2153_p2 = pmov %p2152_p4 }
  0x9a   : > { %vm485_vm0 = vcmask 261120   ;;  %v1681_v0 = vmov 0.0   ;;  %v1969_v1 = vld [vmem:[%s397_s25 + $0x8] sm:$0xf]  ;;  %v1971_v2 = vld [vmem:[%s397_s25] sm:$0xf] }
  0x9b   : > { %1644 = vsyncadd (%p2153_p2), [#allocation10], 4294962688  ;;  %486 = vst.msk [vmem:[#allocation2] sm:$0xff] %vm485_vm0, %v1681_v0  ;;  %s1682_s18 = smov 32   ;;  %v1977_v3 = vld [vmem:[%s397_s25 + $0x4] sm:$0xf] }
  0x9c   : > { %487 = vst.msk [vmem:[#allocation2 + $0x8] sm:$0xff] %vm485_vm0, %v1681_v0  ;;  %556 = vrot.lane.b32.xlu1 %v1969_v1, %s1682_s18  ;;  %552 = vrot.lane.b32.xlu0 %v1971_v2, %s1682_s18  ;;  %v1979_v4 = vld [vmem:[%s397_s25 + $0xc] sm:$0xf]  ;;  %v533_v5 = vrot.slane %v1977_v3, 1  ;;  %v532_v6 = vrot.slane %v1971_v2, 1  ;;  %v707_v7 = vld [vmem:[#allocation9 + $0x60] sm:$0xff] }
  0x9d   : > { %v708_v8 = vld [vmem:[#allocation9 + $0x68] sm:$0xff]  ;;  %vm543_vm1 = vcmask 1042432   ;;  %v709_v10 = vld [vmem:[#allocation9 + $0x70] sm:$0xff]  ;;  %v710_v11 = vld [vmem:[#allocation9 + $0x78] sm:$0xff]  ;;  %v535_v16 = vrot.slane %v1979_v4, 1  ;;  %v534_v23 = vrot.slane %v1969_v1, 1 }
  0x9e   : > { %v1318_v9 = vpack.c.bf16 %v708_v8, %v707_v7  ;;  %v606_v12 = vld [vmem:[#allocation9] sm:$0xff]  ;;  %v1322_v13 = vpack.c.bf16 %v710_v11, %v709_v10  ;;  %v607_v14 = vld [vmem:[#allocation9 + $0x8] sm:$0xff]  ;;  %v608_v19 = vld [vmem:[#allocation9 + $0x10] sm:$0xff]  ;;  %v546_v21 = vsel %vm543_vm1, %v533_v5, 0.0  ;;  %v545_v22 = vsel %vm543_vm1, %v532_v6, 0.0  ;;  %s1683_s28 = smov 64  }
  0x9f   : > { %v711_v15 = vld [vmem:[#allocation9 + $0x80] sm:$0xff]  ;;  %v1294_v17 = vpack.c.bf16 %v607_v14, %v606_v12  ;;  %v712_v18 = vld [vmem:[#allocation9 + $0x88] sm:$0xff]  ;;  %v609_v20 = vld [vmem:[#allocation9 + $0x18] sm:$0xff]  ;;  %v548_v30 = vsel %vm543_vm1, %v535_v16, 0.0  ;;  %v547_v31 = vsel %vm543_vm1, %v534_v23, 0.0  ;;  %v531_v32 = vrot.slane %v1681_v0, 1 }
  0xa0   : > { %558 = vrot.lane.b32.xlu1 %v1979_v4, %s1682_s18  ;;  %554 = vrot.lane.b32.xlu0 %v1977_v3, %s1682_s18  ;;  %v1298_v24 = vpack.c.bf16 %v609_v20, %v608_v19  ;;  %v610_v25 = vld [vmem:[#allocation9 + $0x20] sm:$0xff]  ;;  %v611_v26 = vld [vmem:[#allocation9 + $0x28] sm:$0xff]  ;;  %v1326_v27 = vpack.c.bf16 %v712_v18, %v711_v15  ;;  %v713_v28 = vld [vmem:[#allocation9 + $0x90] sm:$0xff]  ;;  %v513_v56 = vrot.slane %v1971_v2, 7  ;;  %v514_v57 = vrot.slane %v1977_v3, 7  ;;  %s1169_s8 = sshll.u32 %s1663_s24, 8 }
  0xa1   : > { %1319 = vmatprep.subr.bf16.mxu0 %v1318_v9  ;;  %1295 = vmatprep.subr.bf16.mxu1 %v1294_v17  ;;  %v714_v29 = vld [vmem:[#allocation9 + $0x98] sm:$0xff]  ;;  %v1302_v33 = vpack.c.bf16 %v611_v26, %v610_v25  ;;  %v612_v34 = vld [vmem:[#allocation9 + $0x30] sm:$0xff]  ;;  %v715_v37 = vld [vmem:[#allocation9 + $0xa0] sm:$0xff]  ;;  %v544_v39 = vsel %vm543_vm1, %v531_v32, 0.0  ;;  %vm524_vm2 = vcmask 1040384   ;;  %v515_v60 = vrot.slane %v1969_v1, 7 }
  0xa2   : > { %1321 = vmatpush3.bf16.msra.mxu0 %v1318_v9  ;;  %1297 = vmatpush3.bf16.msra.mxu1 %v1294_v17  ;;  %v613_v35 = vld [vmem:[#allocation9 + $0x38] sm:$0xff]  ;;  %v1330_v36 = vpack.c.bf16 %v714_v29, %v713_v28  ;;  %v716_v38 = vld [vmem:[#allocation9 + $0xa8] sm:$0xff]  ;;  %v614_v41 = vld [vmem:[#allocation9 + $0x40] sm:$0xff]  ;;  %v516_v61 = vrot.slane %v1979_v4, 7  ;;  %v526_v62 = vsel %vm524_vm2, 0.0, %v513_v56  ;;  %v527_v63 = vsel %vm524_vm2, 0.0, %v514_v57 }
  0xa3   : > { %1323 = vmatprep.subr.bf16.mxu0 %v1322_v13  ;;  %1299 = vmatprep.subr.bf16.mxu1 %v1298_v24  ;;  %v1306_v40 = vpack.c.bf16 %v613_v35, %v612_v34  ;;  %v615_v42 = vld [vmem:[#allocation9 + $0x48] sm:$0xff]  ;;  %v1334_v43 = vpack.c.bf16 %v716_v38, %v715_v37  ;;  %v717_v44 = vld [vmem:[#allocation9 + $0xb0] sm:$0xff]  ;;  %v718_v45 = vld [vmem:[#allocation9 + $0xb8] sm:$0xff]  ;;  %vm599_vm3 = vcmask 523264   ;;  %vm624_vm4 = vcmask 785408   ;;  %s2154_s14 = sld [smem:[#allocation22_spill]] }
  0xa4   : > { %578 = vrot.lane.b32.xlu1 %v546_v21, %s1683_s28  ;;  %576 = vrot.lane.b32.xlu0 %v545_v22, %s1683_s28  ;;  %v1310_v46 = vpack.c.bf16 %v615_v42, %v614_v41  ;;  %v616_v47 = vld [vmem:[#allocation9 + $0x50] sm:$0xff]  ;;  %v617_v48 = vld [vmem:[#allocation9 + $0x58] sm:$0xff]  ;;  %v1338_v49 = vpack.c.bf16 %v718_v45, %v717_v44  ;;  %v804_v50 = vld [vmem:[#allocation9 + $0xc0] sm:$0xff]  ;;  %v528_v3 = vsel %vm524_vm2, 0.0, %v515_v60  ;;  %v529_v8 = vsel %vm524_vm2, 0.0, %v516_v61  ;;  %s463_s9 = scalar_lea.vmem [#allocation11], %s1147_s21 }
  0xa5   : > { %v805_v51 = vld [vmem:[#allocation9 + $0xc8] sm:$0xff]  ;;  %v1314_v52 = vpack.c.bf16 %v617_v48, %v616_v47  ;;  %v512_v10 = vrot.slane %v1681_v0, 7  ;;  %v806_v11 = vld [vmem:[#allocation9 + $0xd0] sm:$0xff]  ;;  %v807_v12 = vld [vmem:[#allocation9 + $0xd8] sm:$0xff]  ;;  %vm926_vm5 = vcmask 257024   ;;  %s948_s1 = sshll.u32 %s463_s9, 4  ;;  %s2049_s1 = int_to_ptr.vmem [resolvable:$true] %s948_s1 }
  0xa6   : > { %1325 = vmatpush3.bf16.msra.mxu0 %v1322_v13  ;;  %1301 = vmatpush3.bf16.msra.mxu1 %v1298_v24  ;;  %v1342_v53 = vpack.c.bf16 %v805_v51, %v804_v50  ;;  %v1346_v22 = vpack.c.bf16 %v807_v12, %v806_v11  ;;  %v809_v23 = vld [vmem:[#allocation9 + $0xe8] sm:$0xff]  ;;  %v812_v38 = vld [vmem:[#allocation9 + $0x100] sm:$0xff]  ;;  %v814_v41 = vld [vmem:[#allocation9 + $0x110] sm:$0xff]  ;;  %s2155_s19 = sld [smem:[#allocation25_spill]]  ;;  %s932_s24 = scalar_lea.sflag [#allocation5], %s1946_s29 }
  0xa7   : > { %1327 = vmatprep.subr.bf16.mxu0 %v1326_v27  ;;  %1303 = vmatprep.subr.bf16.mxu1 %v1302_v33  ;;  %v525_v21 = vsel %vm524_vm2, 0.0, %v512_v10  ;;  %v815_v42 = vld [vmem:[#allocation9 + $0x118] sm:$0xff]  ;;  %v488_v47 = vld [vmem:[#allocation2] sm:$0xff]  ;;  %s1581_s30 = scalar_lea.vmem %s2049_s1, 256  ;;  %s1684_s15 = smov [#allocation11]  }
  0xa8   : > { %582 = vrot.lane.b32.xlu1 %v548_v30, %s1683_s28  ;;  %580 = vrot.lane.b32.xlu0 %v547_v31, %s1683_s28  ;;  %v810_v30 = vld [vmem:[#allocation9 + $0xf0] sm:$0xff]  ;;  %v811_v31 = vld [vmem:[#allocation9 + $0xf8] sm:$0xff]  ;;  %v1158_v51 = vld [vmem:[%s2104_s4] ss:$0 sm:$0xff]  ;;  %p1582_p5 = scmp.ne.s32.totalorder %s2049_s1, %s1581_s30  ;;  %s1585_s23 = sshll.u32 %s1684_s15, 4  ;;  %s1586_s23 = int_to_ptr.vmem [resolvable:$false] %s1585_s23 }
  0xa9   : > { %p2156_p10 = scmp.ne.s32.totalorder %s2154_s14, 0  ;;  %s1587_s6 = scalar_lea.vmem %s1586_s23, 512 }
  0xaa   : > { %1329 = vmatpush3.bf16.msra.mxu0 %v1326_v27  ;;  %1305 = vmatpush3.bf16.msra.mxu1 %v1302_v33  ;;  %p1588_p3 = scmp.lt.s32.totalorder %s2049_s1, %s1586_s23  ;;  %p1589_p6 = scmp.lt.s32.totalorder %s1587_s6, %s1581_s30 }
  0xab   : > { %1331 = vmatprep.subr.bf16.mxu0 %v1330_v36  ;;  %1307 = vmatprep.subr.bf16.mxu1 %v1306_v40  ;;  %p1583_p13 = pnand %p1582_p5, %p2156_p10 }
  0xac   : > { %550 = vrot.lane.b32.xlu0 %v1681_v0, %s1682_s18  ;;  %574 = vrot.lane.b32.xlu1 %v544_v39, %s1683_s28  ;;  %s2047_s12 = scalar_lea.hbm %s2155_s19, %s1169_s8  ;;  %p1590_p8 = por %p1589_p6, %p1588_p3 }
  0xad   : > { %p1584_p7 = pneg %p1583_p13 }
  0xae   : > { %1333 = vmatpush3.bf16.msra.mxu0 %v1330_v36  ;;  %1309 = vmatpush3.bf16.msra.mxu1 %v1306_v40  ;;  %v1354_v36 = vpack.c.bf16 %v811_v31, %v810_v30 }
  0xaf   : > { %1335 = vmatprep.subr.bf16.mxu0 %v1334_v43  ;;  %1311 = vmatprep.subr.bf16.mxu1 %v1310_v46  ;;  %p1591_p12 = pnand %p1590_p8, %p1584_p7 }
  0xb0   : > { %560 = vrot.lane.b32.xlu0 %v1681_v0, %s1682_s18  ;;  %584 = vrot.lane.b32.xlu1 %v544_v39, %s1683_s28  ;;  %v808_v0 = vld [vmem:[#allocation9 + $0xe0] sm:$0xff]  ;;  %v813_v39 = vld [vmem:[#allocation9 + $0x108] sm:$0xff] }
  0xb1   : > { %v1350_v28 = vpack.c.bf16 %v809_v23, %v808_v0  ;;  %v1358_v40 = vpack.c.bf16 %v813_v39, %v812_v38 }
  0xb2   : > { %1337 = vmatpush3.bf16.msra.mxu0 %v1334_v43  ;;  %1313 = vmatpush3.bf16.msra.mxu1 %v1310_v46  ;;  %v1362_v43 = vpack.c.bf16 %v815_v42, %v814_v41  ;;  %v489_v46 = vld [vmem:[#allocation2 + $0x8] sm:$0xff] }
  0xb3   : > { %1339 = vmatprep.subr.bf16.mxu0 %v1338_v49  ;;  %1315 = vmatprep.subr.bf16.mxu1 %v1314_v52 }
  0xb6   : > { %1341 = vmatpush3.bf16.msra.mxu0 %v1338_v49  ;;  %1317 = vmatpush3.bf16.msra.mxu1 %v1314_v52 }
  0xb7   : > { %1343 = vmatprep.subr.bf16.mxu0 %v1342_v53 }
 0x10e   : > { %v557_v54 = vpop.permute.xlu1 %556  ;;  %v553_v55 = vpop.permute.xlu0 %552 }
 0x10f   : > { %v594_v5 = vsel %vm485_vm0, %v526_v62, %v553_v55  ;;  %v596_v13 = vsel %vm485_vm0, %v528_v3, %v557_v54  ;;  %v1159_v54 = vld [vmem:[%s2105_s5] ss:$0 sm:$0xff] }
 0x112   : > { %v559_v58 = vpop.permute.xlu1 %558  ;;  %v555_v59 = vpop.permute.xlu0 %554 }
 0x113   : > { %v595_v6 = vsel %vm485_vm0, %v527_v63, %v555_v59  ;;  %v597_v14 = vsel %vm485_vm0, %v529_v8, %v559_v58 }
 0x116   : > { %v579_v7 = vpop.permute.xlu1 %578  ;;  %v577_v2 = vpop.permute.xlu0 %576 }
 0x117   : > { %v602_v1 = vsel %vm599_vm3, %v595_v6, %v579_v7  ;;  %v601_v4 = vsel %vm599_vm3, %v594_v5, %v577_v2 }
 0x118   : > { %v720_v9 = vcombine.low %v601_v4, %v602_v1 }
 0x11a   : > { %v583_v15 = vpop.permute.xlu1 %582  ;;  %v581_v16 = vpop.permute.xlu0 %580  ;;  %1264 = vmatprep.mubr.msk.f32.mxu0 %vm624_vm4, %v720_v9 }
 0x11b   : > { %v604_v17 = vsel %vm599_vm3, %v597_v14, %v583_v15  ;;  %v603_v18 = vsel %vm599_vm3, %v596_v13, %v581_v16 }
 0x11c   : > { %v623_v19 = vcombine.low %v602_v1, %v603_v18  ;;  %v721_v20 = vcombine.low %v603_v18, %v604_v17 }
 0x11e   : > { %v551_v24 = vpop.permute.xlu0 %550  ;;  %1265 = vmatmul.mubr.msk.f32.vlgmr.msra.gmra.mrb[0].mxu0 %vm624_vm4, %v721_v20  ;;  %v575_v25 = vpop.permute.xlu1 %574 }
 0x11f   : > { %v593_v26 = vsel %vm485_vm0, %v525_v21, %v551_v24  ;;  %1345 = vmatpush3.bf16.msra.mxu0 %v1342_v53  ;;  %1291 = vmatprep.mubr.msk.f32.mxu0 %vm624_vm4, %v623_v19 }
 0x120   : > { %v600_v27 = vsel %vm599_vm3, %v593_v26, %v575_v25  ;;  %1347 = vmatprep.subr.bf16.mxu0 %v1346_v22 }
 0x121   : > { %v622_v29 = vcombine.low %v600_v27, %v601_v4 }
 0x122   : > { %v561_v32 = vpop.permute.xlu0 %560  ;;  %v585_v33 = vpop.permute.xlu1 %584 }
 0x123   : > { %v598_v34 = vsel %vm485_vm0, %v525_v21, %v561_v32  ;;  %1349 = vmatpush3.bf16.msra.mxu0 %v1346_v22  ;;  %1237 = vmatprep.mubr.msk.f32.mxu1 %vm624_vm4, %v622_v29 }
 0x124   : > { %v605_v35 = vsel %vm599_vm3, %v598_v34, %v585_v33  ;;  %1238 = vmatmul.mubr.msk.f32.vlgmr.msra.gmra.mrb[0].mxu1 %vm624_vm4, %v623_v19  ;;  %1351 = vmatprep.subr.bf16.mxu0 %v1350_v28 }
 0x125   : > { %v817_v37 = vcombine.low %v604_v17, %v605_v35 }
 0x127   : > { %1353 = vmatpush3.bf16.msra.mxu0 %v1350_v28 }
 0x128   : > { %1355 = vmatprep.subr.bf16.mxu0 %v1354_v36 }
 0x12b   : > { %1357 = vmatpush3.bf16.msra.mxu0 %v1354_v36 }
 0x12c   : > { %1359 = vmatprep.subr.bf16.mxu0 %v1358_v40 }
 0x12f   : > { %1361 = vmatpush3.bf16.msra.mxu0 %v1358_v40 }
 0x130   : > { %1363 = vmatprep.subr.bf16.mxu0 %v1362_v43 }
 0x133   : > { %1365 = vmatpush3.bf16.msra.mxu0 %v1362_v43 }
 0x136   : > { %1292 = vmatmul.mubr.msk.f32.vlgmr.msra.gmra.mrb[0].mxu0 %vm624_vm4, %v817_v37 }
 0x1f7   : > { %v1239_v44 = vpop.f32.mrb[0].mxu1 }
 0x1f8   : > { %v695_v45 = vpop.f32.mrb[1].mxu1  ;;  %v705_v48 = vadd.f32 %v1239_v44, %v489_v46 }
 0x1f9   : > { %v704_v49 = vadd.f32 %v695_v45, %v488_v47 }
 0x209   : > { %v1293_v50 = vpop.f32.mrb[0].mxu0 }
 0x20a   : > { %v1367_v52 = vadd.f32 %v1293_v50, %v705_v48  ;;  %v886_v53 = vpop.f32.mrb[1].mxu0 }
 0x20b   : > { %v1369_v55 = vadd.f32 %v886_v53, %v704_v49 }
 0x20c   : > { %898 = vst.msk [vmem:[#allocation2 + $0x8] sm:$0xff] %vm485_vm0, %v1367_v52  ;;  %v910_v56 = vmul.f32 %v1367_v52, %v1158_v51 }
 0x20d   : > { %897 = vst.msk [vmem:[#allocation2] sm:$0xff] %vm485_vm0, %v1369_v55  ;;  %v909_v57 = vmul.f32 %v1369_v55, %v1158_v51 }
 0x20e   : > { %v919_v58 = vadd.f32 %v1159_v54, %v910_v56 }
 0x20f   : > { %v918_v59 = vadd.f32 %v1159_v54, %v909_v57 }
 0x210   : > { %v923_v60 = vcombine.high %v919_v58, %v919_v58  ;;  %929 = vst.msk [vmem:[%s463_s9 + $0x8] sm:$0xf] %vm926_vm5, %v919_v58 }
 0x211   : > { %v922_v61 = vcombine.high %v918_v59, %v918_v59  ;;  %927 = vst.msk [vmem:[%s463_s9] sm:$0xf] %vm926_vm5, %v918_v59 }
 0x212   : > { %930 = vst.msk [vmem:[%s463_s9 + $0xc] sm:$0xf] %vm926_vm5, %v923_v60 }
 0x213   : > { %928 = vst.msk [vmem:[%s463_s9 + $0x4] sm:$0xf] %vm926_vm5, %v922_v61 }
 0x214   : > { %1594 = shalt.err (!%p1591_p12)
}
 0x215   : > { %s1595_s21 = scalar_lea.hbm %s2047_s12, 256  ;;  %s1599_s11 = scalar_lea.hbm %s2155_s19, 512 }
 0x216   : > { %p1596_p0 = scmp.ne.s32.totalorder %s2047_s12, %s1595_s21  ;;  %p1600_p9 = scmp.lt.u32.totalorder %s2047_s12, %s2155_s19 }
 0x217   : > { %p1601_p4 = scmp.lt.u32.totalorder %s1599_s11, %s1595_s21  ;;  %p1603_p5 = scmp.lt.u32.totalorder %s1595_s21, %s2047_s12 }
 0x218   : > { %p1597_p11 = pnand %p1596_p0, %p2156_p10 }
 0x219   : > { %p1602_p2 = por %p1601_p4, %p1600_p9 }
 0x21a   : > { %p1598_p1 = pneg %p1597_p11 }
 0x21b   : > { %p1604_p13 = por %p1603_p5, %p1602_p2 }
 0x21d   : > { %p1605_p7 = pnand %p1604_p13, %p1598_p1 }
 0x21f   : > { %1608 = shalt.err (!%p1605_p7)
}
 0x220   : > { %s1685_s13 = smov 4  }
 0x221   : > { %1382 = dma.vmem_to_hbm [thread:$0]  (%p2156_p10), %s2049_s1, 256, %s2047_s12, %s932_s24, %s1683_s28, %s1683_s28, %s1685_s13  }
 0x222 PF: > { %s2157_s26 = sld [smem:[#allocation16_spill]]  ;;  %s2158_s27 = sld [smem:[#allocation23_spill]] }
 0x223   : > { %s2159_s16 = sld [smem:[#allocation19_spill]] }
 0x228   : > { %s963_s8 = sand.u32 1, %s2157_s26   ;;  %p2160_p3 = scmp.ne.s32.totalorder %s2158_s27, 0 }
 0x229   : > { %p2161_p6 = scmp.ge.s32.totalorder %s2159_s16, 2  ;;  %s964_s9 = scalar_lea.sflag [#allocation5], %s963_s8 }
 0x22b   : > { %p1399_p8 = pnand %p2161_p6, %p2160_p3 }
 0x22d   : > { %1646 = dma.done.wait (!%p1399_p8), %s964_s9, 256  }
 0x22e   : > { %1648 = vsyncadd (!%p1399_p8), %s964_s9, 4294967040  ;;  %s26_s26 = sadd.s32 1, %s2159_s16   ;;  %s2162_s14 = sld [smem:[#allocation17_spill]] }
 0x22f   : > { %p23_p12 = scmp.ge.s32.totalorder %s26_s26, 4   ;;  %s2163_s23 = sld [smem:[#allocation21_spill]] }
 0x230   : > { %s2164_s24 = sld [smem:[#allocation18_spill]]  ;;  %s2165_s25 = sld [smem:[#allocation20_spill]] }
 0x231   : > { %s2166_s21 = smov %s1655_s22  ;;  %25 = sbr.rel (!%p23_p12) target bundleno = 12 (0xc), region = 134 }
 0x234   : > { %s2167_s22 = smov %s2162_s14 }
 0x238   :  { %969 = vsyncpa [#allocation4], 1 }
 0x239   :  { %971 = vsyncpa [#allocation4 + $0x1], 1 }
 0x23a   :  { %972 = vsyncpa [#allocation7], 1 }
 0x23b   :  { %974 = vsyncpa [#allocation7 + $0x1], 1 }
 0x23c   :  { %975 = vsyncpa [#allocation10], 1 }
 0x23d   :  { %976 = vsyncpa [#allocation5], 1 }
 0x23e   :  { %978 = vsyncpa [#allocation5 + $0x1], 1 }

</bundles_post_ra>
